<compile_context>
chip_gen: v5e
topology: v5e:2x2
jax: 0.10.0
libtpu: 0.0.40
codegen_flags: <defaults>
</compile_context>

<pallas_src>
import functools

import jax
import jax.numpy as jnp
from jax import lax
from jax.experimental import pallas as pl
from jax.experimental.pallas import tpu as pltpu


def _zero_one_kernel(pred_ref, y_ref, out_ref, acc_ref, *,
                     T, B, tile_t, tile_b, inv_total):
    """One (tile_t, tile_b) tile per grid step.

    acc_ref is an (8, tile_b) f32 accumulator: per step we do elementwise
    compares and fold the tile's sublane octets together with plain vreg
    adds (VPU only).  The cross-lane/sublane XLU reduce and the 1/(T*B)
    scale run once, on the last grid step.
    """
    tt = pl.program_id(0)
    tb = pl.program_id(1)
    n_t = pl.num_programs(0)
    n_b = pl.num_programs(1)

    @pl.when((tt == 0) & (tb == 0))
    def _():
        acc_ref[...] = jnp.zeros_like(acc_ref)

    def accumulate(mask=None):
        # y entries are +/-1, so (y >= 0) <=> (y == +1); pred >= 0 maps
        # pred == 0 to the +1 class (same convention as the reference).
        mismatch = ((pred_ref[...] >= 0) != (y_ref[...] >= 0)).astype(jnp.float32)
        if mask is not None:
            mismatch = jnp.where(mask, mismatch, 0.0)
        # Fold row tile into the (8, tile_b) accumulator: grouping sublane
        # octets is a free reshape; the group sum is whole-vreg VPU adds.
        acc_ref[...] += mismatch.reshape(tile_t // 8, 8, tile_b).sum(axis=0)

    row_edge = (T % tile_t) != 0        # static (Python) flags
    col_edge = (B % tile_b) != 0

    if row_edge or col_edge:
        edge_conds = []
        if row_edge:
            edge_conds.append(tt == n_t - 1)
        if col_edge:
            edge_conds.append(tb == n_b - 1)
        is_edge = functools.reduce(jnp.logical_or, edge_conds)

        @pl.when(is_edge)
        def _():
            mask = None
            if row_edge:
                rows = lax.broadcasted_iota(jnp.int32, (tile_t, tile_b), 0) + tt * tile_t
                mask = rows < T
            if col_edge:
                cols = lax.broadcasted_iota(jnp.int32, (tile_t, tile_b), 1) + tb * tile_b
                cmask = cols < B
                mask = cmask if mask is None else jnp.logical_and(mask, cmask)
            accumulate(mask)

        @pl.when(jnp.logical_not(is_edge))
        def _():
            accumulate()
    else:
        accumulate()

    @pl.when((tt == n_t - 1) & (tb == n_b - 1))
    def _():
        total = jnp.sum(acc_ref[...]) * inv_total
        out_ref[...] = jnp.broadcast_to(total, out_ref.shape).astype(out_ref.dtype)


def online_zero_one_loss(pred, y, *, max_tile_bytes=2 << 20):
    """pred, y: (T, B) arrays (y entries +/-1). Returns scalar mean 0/1 loss."""
    assert pred.shape == y.shape
    T, B = pred.shape
    inv_total = 1.0 / float(T * B)
    itemsize = jnp.dtype(pred.dtype).itemsize

    # --- lane (B) blocking -------------------------------------------------
    # Full-width tiles unless a single 8-row stripe would blow the per-input
    # tile budget; then block B into lane-dense (multiple-of-128) chunks and
    # mask the ragged last chunk in-kernel.
    lane_budget = max(128, (max_tile_bytes // (8 * itemsize)) // 128 * 128)
    if B <= lane_budget:
        tile_b = B                  # full array width (always a legal block dim)
    else:
        tile_b = lane_budget
    n_b = pl.cdiv(B, tile_b)

    # --- row (T) tiling ------------------------------------------------------
    # Biggest multiple-of-8 row tile under the byte budget; no HBM padding —
    # a ragged last tile is masked in-kernel.
    rows_budget = max(8, (max_tile_bytes // (tile_b * itemsize)) // 8 * 8)
    if T >= 8:
        tile_t = min(rows_budget, (T // 8) * 8)
    else:
        tile_t = 8                  # block overhangs the array; rows masked in-kernel
    n_t = pl.cdiv(T, tile_t)

    # --- explicit scoped-VMEM budget ----------------------------------------
    in_tile_bytes = tile_t * tile_b * (itemsize + jnp.dtype(y.dtype).itemsize)
    vmem_need = (2 * in_tile_bytes          # 2 pipeline buffers per input
                 + 8 * tile_b * 4           # accumulator scratch
                 + 2 * 8 * 128 * 4          # output slab (double-buffered)
                 + (2 << 20))               # slack
    vmem_limit = int(min(max(vmem_need, 16 << 20), 64 << 20))

    kernel = functools.partial(
        _zero_one_kernel, T=T, B=B, tile_t=tile_t, tile_b=tile_b,
        inv_total=inv_total)

    out = pl.pallas_call(
        kernel,
        out_shape=jax.ShapeDtypeStruct((8, 128), jnp.float32),
        grid_spec=pltpu.PrefetchScalarGridSpec(
            num_scalar_prefetch=0,
            grid=(n_t, n_b),
            in_specs=[
                pl.BlockSpec((tile_t, tile_b), lambda tt, tb: (tt, tb)),
                pl.BlockSpec((tile_t, tile_b), lambda tt, tb: (tt, tb)),
            ],
            out_specs=pl.BlockSpec((8, 128), lambda tt, tb: (0, 0)),
            scratch_shapes=[pltpu.VMEM((8, tile_b), jnp.float32)],
        ),
        compiler_params=pltpu.CompilerParams(
            dimension_semantics=("arbitrary", "arbitrary"),
            vmem_limit_bytes=vmem_limit,
        ),
    )(pred, y)

    return out[0, 0]


if __name__ == "__main__":
    key = jax.random.PRNGKey(0)
    k_pred, k_y = jax.random.split(key)

    def ref_loss(pred, y):
        return jnp.mean((jnp.where(pred >= 0.0, 1.0, -1.0) != y).astype(jnp.float32))

    # Online setting: T = 16 rounds, B = 128 examples/round (single-tile fast path).
    T, B = 16, 128
    pred = jax.random.normal(k_pred, (T, B), dtype=jnp.float32)
    y = jnp.where(jax.random.bernoulli(k_y, 0.5, (T, B)), 1.0, -1.0).astype(jnp.float32)
    loss = jax.block_until_ready(online_zero_one_loss(pred, y))
    assert jnp.allclose(loss, ref_loss(pred, y), atol=1e-6), (loss, ref_loss(pred, y))

    # T not divisible by the row tile -> in-kernel row masking (no HBM padding copy).
    pred2 = jax.random.normal(jax.random.PRNGKey(1), (13, 128), dtype=jnp.float32)
    y2 = jnp.where(jax.random.bernoulli(jax.random.PRNGKey(2), 0.5, (13, 128)),
                   1.0, -1.0).astype(jnp.float32)
    loss2 = jax.block_until_ready(online_zero_one_loss(pred2, y2))
    assert jnp.allclose(loss2, ref_loss(pred2, y2), atol=1e-6), (loss2, ref_loss(pred2, y2))

    # Tiny tile budget -> forces lane (B) blocking plus row+lane edge masking.
    pred3 = jax.random.normal(jax.random.PRNGKey(3), (12, 300), dtype=jnp.float32)
    y3 = jnp.where(jax.random.bernoulli(jax.random.PRNGKey(4), 0.5, (12, 300)),
                   1.0, -1.0).astype(jnp.float32)
    loss3 = jax.block_until_ready(online_zero_one_loss(pred3, y3, max_tile_bytes=4096))
    assert jnp.allclose(loss3, ref_loss(pred3, y3), atol=1e-6), (loss3, ref_loss(pred3, y3))

    print("KERNEL_OK")
</pallas_src>

<mosaic_0001>
module attributes {stable_mosaic.version = 11 : i64} {
  func.func @_zero_one_kernel(%arg0: i32, %arg1: i32, %arg2: memref<16x128xf32, #tpu.memory_space<vmem>>, %arg3: memref<16x128xf32, #tpu.memory_space<vmem>>, %arg4: memref<8x128xf32, #tpu.memory_space<vmem>>, %arg5: memref<8x128xf32, #tpu.memory_space<vmem>>) attributes {dimension_semantics = [#tpu.dimension_semantics<arbitrary>, #tpu.dimension_semantics<arbitrary>], iteration_bounds = array<i64: 1, 1>, scalar_prefetch = 0 : i64, scratch_operands = 1 : i64, tpu.core_type = #tpu.core_type<tc>, window_params = [{transform_indices = @transform_0, window_bounds = array<i64: 16, 128>}, {transform_indices = @transform_1, window_bounds = array<i64: 16, 128>}, {pipeline_mode = #tpu.pipeline_mode<synchronous>, transform_indices = @transform_2, window_bounds = array<i64: 8, 128>}]} {
    %c0_i32 = arith.constant 0 : i32
    %0 = arith.cmpi eq, %arg0, %c0_i32 : i32
    %c0_i32_0 = arith.constant 0 : i32
    %1 = arith.cmpi eq, %arg1, %c0_i32_0 : i32
    %2 = arith.andi %0, %1 : i1
    %3 = arith.extui %2 : i1 to i32
    %c0_i32_1 = arith.constant 0 : i32
    %4 = arith.cmpi ne, %3, %c0_i32_1 : i32
    scf.if %4 {
      %cst_14 = arith.constant 0.000000e+00 : f32
      %24 = vector.broadcast %cst_14 : f32 to vector<8x128xf32>
      %c0_15 = arith.constant 0 : index
      %c0_16 = arith.constant 0 : index
      %25 = vector.load %arg5[%c0_15, %c0_16] : memref<8x128xf32, #tpu.memory_space<vmem>>, vector<8x128xf32>
      tpu.vector_store %arg5[%c0_15, %c0_16], %24 {strides = array<i32>} : memref<8x128xf32, #tpu.memory_space<vmem>>, vector<8x128xf32>,
    } else {
    }
    %c0 = arith.constant 0 : index
    %c0_2 = arith.constant 0 : index
    %5 = vector.load %arg2[%c0, %c0_2] : memref<16x128xf32, #tpu.memory_space<vmem>>, vector<16x128xf32>
    %cst = arith.constant 0.000000e+00 : f32
    %6 = vector.broadcast %cst : f32 to vector<16x128xf32>
    %7 = arith.cmpf oge, %5, %6 : vector<16x128xf32>
    %c0_3 = arith.constant 0 : index
    %c0_4 = arith.constant 0 : index
    %8 = vector.load %arg3[%c0_3, %c0_4] : memref<16x128xf32, #tpu.memory_space<vmem>>, vector<16x128xf32>
    %cst_5 = arith.constant 0.000000e+00 : f32
    %9 = vector.broadcast %cst_5 : f32 to vector<16x128xf32>
    %10 = arith.cmpf oge, %8, %9 : vector<16x128xf32>
    %11 = arith.xori %7, %10 : vector<16x128xi1>
    %12 = arith.extui %11 : vector<16x128xi1> to vector<16x128xi32>
    %13 = arith.sitofp %12 : vector<16x128xi32> to vector<16x128xf32>
    %c0_6 = arith.constant 0 : index
    %c0_7 = arith.constant 0 : index
    %14 = vector.load %arg5[%c0_6, %c0_7] : memref<8x128xf32, #tpu.memory_space<vmem>>, vector<8x128xf32>
    %15 = vector.shape_cast %13 : vector<16x128xf32> to vector<2x8x128xf32>
    %cst_8 = arith.constant dense<0.000000e+00> : vector<8x128xf32>
    %16 = vector.multi_reduction <add>, %15, %cst_8 [0] : vector<2x8x128xf32> to vector<8x128xf32>
    %17 = arith.addf %14, %16 : vector<8x128xf32>
    %c0_9 = arith.constant 0 : index
    %c0_10 = arith.constant 0 : index
    %18 = vector.load %arg5[%c0_9, %c0_10] : memref<8x128xf32, #tpu.memory_space<vmem>>, vector<8x128xf32>
    tpu.vector_store %arg5[%c0_9, %c0_10], %17 {strides = array<i32>} : memref<8x128xf32, #tpu.memory_space<vmem>>, vector<8x128xf32>,
    %c0_i32_11 = arith.constant 0 : i32
    %19 = arith.cmpi eq, %arg0, %c0_i32_11 : i32
    %c0_i32_12 = arith.constant 0 : i32
    %20 = arith.cmpi eq, %arg1, %c0_i32_12 : i32
    %21 = arith.andi %19, %20 : i1
    %22 = arith.extui %21 : i1 to i32
    %c0_i32_13 = arith.constant 0 : i32
    %23 = arith.cmpi ne, %22, %c0_i32_13 : i32
    scf.if %23 {
      %c0_14 = arith.constant 0 : index
      %c0_15 = arith.constant 0 : index
      %24 = vector.load %arg5[%c0_14, %c0_15] : memref<8x128xf32, #tpu.memory_space<vmem>>, vector<8x128xf32>
      %25 = vector.shape_cast %24 : vector<8x128xf32> to vector<1x8x128xf32>
      %cst_16 = arith.constant dense<0.000000e+00> : vector<1xf32>
      %26 = vector.multi_reduction <add>, %25, %cst_16 [1, 2] : vector<1x8x128xf32> to vector<1xf32>
      %27 = vector.shape_cast %26 : vector<1xf32> to vector<1x1x1xf32>
      %28 = vector.extract %27[0, 0, 0] : f32 from vector<1x1x1xf32>
      %cst_17 = arith.constant 4.8828125E-4 : f32
      %29 = arith.mulf %28, %cst_17 : f32
      %30 = vector.broadcast %29 : f32 to vector<8x128xf32>
      %c0_18 = arith.constant 0 : index
      %c0_19 = arith.constant 0 : index
      %31 = vector.load %arg4[%c0_18, %c0_19] : memref<8x128xf32, #tpu.memory_space<vmem>>, vector<8x128xf32>
      tpu.vector_store %arg4[%c0_18, %c0_19], %30 {strides = array<i32>} : memref<8x128xf32, #tpu.memory_space<vmem>>, vector<8x128xf32>,
    } else {
    }
    return
  }
  func.func @transform_0(%arg0: i32, %arg1: i32) -> (i32, i32) {
    %c0_i32 = arith.constant 0 : i32
    return %arg0, %arg1 : i32, i32
  }
  func.func @transform_1(%arg0: i32, %arg1: i32) -> (i32, i32) {
    %c0_i32 = arith.constant 0 : i32
    return %arg0, %arg1 : i32, i32
  }
  func.func @transform_2(%arg0: i32, %arg1: i32) -> (i32, i32) {
    %c0_i32 = arith.constant 0 : i32
    %c0_i32_0 = arith.constant 0 : i32
    %c0_i32_1 = arith.constant 0 : i32
    return %c0_i32, %c0_i32_0 : i32, i32
  }
}

</mosaic_0001>

<bundles_post_ra>
// kernel: tpu_custom_call.1
= control target key start
LH: loop header
LB: loop body
LE: loop exit
PB: predicated region body
PF: predicated region fallthrough
CT: control target
= control target key end

     0   :  { %7 = vsyncpa [#allocation4], 0  ;;  %s220_s0 = inlined_call_operand.hbm [shape: f32[16,128], index: 0, kind: input, shape index: {}]   ;;  %s221_s1 = inlined_call_operand.hbm [shape: f32[16,128], index: 1, kind: input, shape index: {}]   ;;  %s222_s2 = inlined_call_operand.hbm [shape: f32[8,128], index: 2, kind: output, shape index: {}]  }
   0x1   :  { %8 = vsyncpa [#allocation7], 0 }
   0x2   :  { %9 = vsyncpa [#allocation5], 0  ;;  %s14_s11 = sshll.u32 %s220_s0, 4  ;;  %s190_s12 = smov [#allocation3]   ;;  %s15_s11 = int_to_ptr.hbm [resolvable:$true] %s14_s11 }
   0x3   :  { %s16_s13 = sshll.u32 %s190_s12, 4  ;;  %s27_s16 = sshll.u32 %s221_s1, 4  ;;  %s17_s13 = int_to_ptr.vmem [resolvable:$true] %s16_s13  ;;  %s28_s16 = int_to_ptr.hbm [resolvable:$true] %s27_s16 }
   0x4   :  { %s191_s17 = smov 128   ;;  %s192_s18 = smov 8  }
   0x5   :  { %22 = dma.hbm_to_vmem [thread:$0]  %s15_s11, 256, %s17_s13, [#allocation4], %s191_s17, %s191_s17, %s192_s18  }
   0x6   :  { %s193_s19 = smov [#allocation6]  }
   0x7   :  { %s29_s20 = sshll.u32 %s193_s19, 4  ;;  %s30_s20 = int_to_ptr.vmem [resolvable:$true] %s29_s20 }
   0x8   :  { %35 = dma.hbm_to_vmem [thread:$0]  %s28_s16, 256, %s30_s20, [#allocation7], %s191_s17, %s191_s17, %s192_s18  }
   0x9   :  { %184 = dma.done.wait [#allocation4], 256  }
   0xa   :  { %185 = vsyncadd [#allocation4], 4294967040 }
   0xb   :  { %186 = dma.done.wait [#allocation7], 256  }
   0xc   :  { %187 = vsyncadd [#allocation7], 4294967040  ;;  %v51_v0 = vld [vmem:[#allocation3] sm:$0xff]  ;;  %v52_v1 = vld [vmem:[#allocation3 + $0x8] sm:$0xff]  ;;  %v194_v4 = vmov 0.0   ;;  %s195_s0 = smov [#allocation8]  }
   0xd   :  { %v55_v2 = vld [vmem:[#allocation6] sm:$0xff]  ;;  %vm53_vm0 = vcmp.ge.f32.partialorder %v51_v0, 0.0  ;;  %vm54_vm1 = vcmp.ge.f32.partialorder %v52_v1, 0.0  ;;  %v56_v3 = vld [vmem:[#allocation6 + $0x8] sm:$0xff]  ;;  %s89_s1 = sshll.u32 %s195_s0, 4  ;;  %s91_s23 = sshll.u32 %s222_s2, 4  ;;  %s90_s1 = int_to_ptr.vmem [resolvable:$true] %s89_s1  ;;  %s92_s23 = int_to_ptr.hbm [resolvable:$true] %s91_s23 }
   0xe   :  { %vm57_vm2 = vcmp.ge.f32.partialorder %v55_v2, 0.0  ;;  %vm58_vm3 = vcmp.ge.f32.partialorder %v56_v3, 0.0 }
   0xf   :  { %vm59_vm4 = vmxor %vm53_vm0, %vm57_vm2 }
  0x10   :  { %vm60_vm5 = vmxor %vm54_vm1, %vm58_vm3  ;;  %v102_v5 = vsel %vm59_vm4, 1.0, %v194_v4 }
  0x11   :  { %v103_v6 = vsel %vm60_vm5, 1.0, %v194_v4 }
  0x12   :  { %v66_v7 = vadd.f32 %v103_v6, %v102_v5 }
  0x14   :  { %72 = vadd.xlane.f32.xlu0 %v66_v7 }
  0x87   :  { %v73_v8 = vpop.xlane.xlu0 %72 }
  0x88   :  { %v74_v9 = vrot.slane %v73_v8, 4 }
  0x8a   :  { %v75_v10 = vadd.f32 %v74_v9, %v73_v8 }
  0x8c   :  { %v76_v11 = vrot.slane %v75_v10, 2 }
  0x8e   :  { %v77_v12 = vadd.f32 %v76_v11, %v75_v10 }
  0x90   :  { %v78_v13 = vrot.slane %v77_v12, 1 }
  0x92   :  { %v79_v14 = vadd.f32 %v78_v13, %v77_v12 }
  0x94   :  { %104 = vpush %v79_v14 }
  0xc5   :  { %s105_s24 = spop %104 }
  0xc6   :  { %s81_s25 = smul.f32 0.00048828125, %s105_s24 }
  0xc8   :  { %v82_v15 = vstv %s81_s25 }
  0xc9   :  { %83 = vst [vmem:[#allocation8] sm:$0xff] %v82_v15 }
  0xca   :  { %94 = dma.vmem_to_hbm [thread:$0]  %s90_s1, 128, %s92_s23, [#allocation5]  }
  0xcb   :  { %188 = dma.done.wait [#allocation5], 128  }
  0xcc   :  { %189 = vsyncadd [#allocation5], 4294967168 }
  0xcd   :  { %99 = vsyncpa [#allocation4], 1 }
  0xce   :  { %100 = vsyncpa [#allocation7], 1 }
  0xcf   :  { %101 = vsyncpa [#allocation5], 1 }

</bundles_post_ra>
